<compile_context>
chip_gen: v7x
topology: tpu7x:2x2x1
jax: 0.10.0
libtpu: 0.0.40
codegen_flags: <defaults>
</compile_context>

<pallas_src>
import functools

import jax
import jax.numpy as jnp
from jax.experimental import pallas as pl
from jax.experimental.pallas import tpu as pltpu


def _round_up(x, m):
    return (x + m - 1) // m * m


def _linear_pool_crps_kernel(*refs, num_inputs, support_len, needs_mask):
    """Grid = (B_tiles, S_tiles); S swept sequentially with a per-row prefix carry.

    refs layout (positional):
      w_ref:              (K,)        SMEM   ensemble weights
      x_ref[0..K-1]:      (tb, tn)    VMEM   one PDF tile per ensemble member
      tri_ref:            (tn, tn)    VMEM   upper-triangular ones (resident, DMA'd once)
      out_ref:            (tb, tn)    VMEM   combined CDF tile
      carry_ref:          (tb, 1)     VMEM   running row-sum of all previous support tiles

    CORRECTNESS NOTE: the carry scratch requires that the S axis is the innermost,
    sequentially swept ("arbitrary") grid axis and that it is reset at n == 0 for
    every batch block.  Do not mark the S axis "parallel" or reorder the grid.
    """
    w_ref = refs[0]
    x_refs = refs[1:1 + num_inputs]
    tri_ref = refs[1 + num_inputs]
    out_ref = refs[2 + num_inputs]
    carry_ref = refs[3 + num_inputs]

    n = pl.program_id(1)

    @pl.when(n == 0)
    def _():
        carry_ref[...] = jnp.zeros_like(carry_ref)

    # Weighted combine over the K ensemble members (cheap VPU work, K small & static).
    # Inputs are DMA'd in their native dtype and cast to f32 only in VMEM.
    combined = w_ref[0] * x_refs[0][...].astype(jnp.float32)
    for k in range(1, num_inputs):
        combined = combined + w_ref[k] * x_refs[k][...].astype(jnp.float32)

    tn = combined.shape[-1]

    if needs_mask:
        # Last S tile is ragged: zero the out-of-bounds lanes so garbage (possibly
        # NaN/Inf) in the padded edge block cannot pollute the matmul or the carry.
        lane = jax.lax.broadcasted_iota(jnp.int32, combined.shape, 1)
        combined = jnp.where(lane + n * tn < support_len, combined, 0.0)

    # In-tile cumsum along the lane axis via the resident upper-triangular matmul.
    # HIGHEST precision keeps the prefix sums in full f32 on the MXU.
    local = jnp.dot(combined, tri_ref[...],
                    preferred_element_type=jnp.float32,
                    precision=jax.lax.Precision.HIGHEST)

    # Prefix from previous support tiles + local cumsum.
    out_ref[...] = (carry_ref[...] + local).astype(out_ref.dtype)

    # The last column of the tri matmul is already the full row sum of this tile:
    # reuse it instead of an extra cross-lane reduction.
    carry_ref[...] = carry_ref[...] + local[:, tn - 1:tn]


def linear_pool_crps_forward(list_inputs, weights, apply_softmax=False):
    """JAX/Pallas equivalent of LinearPoolCRPSLayer.forward.

    list_inputs: list of (batch, support_len) float arrays (discrete PDFs)
    weights:     (num_inputs,) float array
    """
    if apply_softmax:
        weights = jax.nn.softmax(weights)
    weights = weights.astype(jnp.float32)

    K = len(list_inputs)
    B, S = list_inputs[0].shape

    # Support tile: lane-dense (multiple of 128) unless S itself is smaller, capped
    # at 256 so the f32 tri-matmul stays hidden under the DMA on v5e/v7x.
    if S < 128:
        tn = S
    else:
        tn = min(256, (S // 128) * 128)

    # Batch tile: multiple of 8 unless B itself is smaller; sized so there are at
    # least 2 batch blocks when possible (v7x has 2 TensorCores), capped at 512.
    if B <= 8:
        tb = B
    else:
        tb = min(512, _round_up(pl.cdiv(B, 2), 8))

    grid = (pl.cdiv(B, tb), pl.cdiv(S, tn))
    needs_mask = (S % tn) != 0

    # Loop-invariant upper-triangular matrix, built once on the host side of the
    # call; its index_map is constant so it is DMA'd once and stays resident.
    row = jax.lax.broadcasted_iota(jnp.int32, (tn, tn), 0)
    col = jax.lax.broadcasted_iota(jnp.int32, (tn, tn), 1)
    tri = (row <= col).astype(jnp.float32)

    in_itemsize = jnp.dtype(list_inputs[0].dtype).itemsize
    cost = pl.CostEstimate(
        flops=2 * B * S * tn + 2 * K * B * S,
        transcendentals=0,
        bytes_accessed=K * B * S * in_itemsize + B * S * 4 + tn * tn * 4,
    )

    in_specs = [pl.BlockSpec(memory_space=pltpu.MemorySpace.SMEM)]          # weights (K,)
    in_specs += [pl.BlockSpec((tb, tn), lambda b, n: (b, n))                # K PDF tiles
                 for _ in range(K)]
    in_specs += [pl.BlockSpec((tn, tn), lambda b, n: (0, 0))]               # resident tri

    out = pl.pallas_call(
        functools.partial(_linear_pool_crps_kernel, num_inputs=K,
                          support_len=S, needs_mask=needs_mask),
        out_shape=jax.ShapeDtypeStruct((B, S), jnp.float32),
        grid_spec=pltpu.PrefetchScalarGridSpec(
            num_scalar_prefetch=0,
            grid=grid,
            in_specs=in_specs,
            out_specs=pl.BlockSpec((tb, tn), lambda b, n: (b, n)),
            scratch_shapes=[pltpu.VMEM((tb, 1), jnp.float32)],              # prefix carry
        ),
        compiler_params=pltpu.CompilerParams(
            dimension_semantics=("parallel", "arbitrary"),
            vmem_limit_bytes=32 * 1024 * 1024,
        ),
        cost_estimate=cost,
    )(weights, *list_inputs, tri)

    return out


def linear_pool_crps_reference(list_inputs, weights, apply_softmax=False):
    """Pure-JAX reference mirroring the PyTorch code."""
    if apply_softmax:
        weights = jax.nn.softmax(weights)
    weighted = [weights[i] * jnp.cumsum(inp, axis=1) for i, inp in enumerate(list_inputs)]
    return sum(weighted)


def _make_inputs(key, num_inputs, batch, support_len):
    keys = jax.random.split(key, num_inputs)
    list_inputs = []
    for k in keys:
        logits = jax.random.normal(k, (batch, support_len), dtype=jnp.float32)
        list_inputs.append(jax.nn.softmax(logits, axis=1))  # valid discrete PDFs
    return list_inputs


if __name__ == "__main__":
    # TODO(synk): train_model (cvxpy simplex projection + optimizer loop) is host-side
    # training code, not part of the forward pass, and is not translated.

    key = jax.random.PRNGKey(0)

    # --- Module-consistent small test: num_inputs=4, batch=8, support_len=16 ---
    num_inputs, batch, support_len = 4, 8, 16
    support = jnp.linspace(0.0, 1.0, support_len)  # unused in forward, kept for parity
    weights = (1.0 / num_inputs) * jnp.ones((num_inputs,), dtype=jnp.float32)
    list_inputs = _make_inputs(key, num_inputs, batch, support_len)

    out = linear_pool_crps_forward(list_inputs, weights, apply_softmax=False)
    out = jax.block_until_ready(out)
    ref = linear_pool_crps_reference(list_inputs, weights, apply_softmax=False)
    assert out.shape == (batch, support_len)
    assert jnp.allclose(out, ref, atol=1e-5, rtol=1e-5)

    # --- Second test: multi-tile S with ragged edge (mask path), ragged batch tile,
    #     bf16 inputs DMA'd without wrapper upcast, softmax on the weights. ---
    num_inputs2, batch2, support_len2 = 3, 20, 640
    key2 = jax.random.PRNGKey(1)
    weights2 = jax.random.normal(key2, (num_inputs2,), dtype=jnp.float32)
    list_inputs2 = [x.astype(jnp.bfloat16)
                    for x in _make_inputs(key2, num_inputs2, batch2, support_len2)]

    out2 = linear_pool_crps_forward(list_inputs2, weights2, apply_softmax=True)
    out2 = jax.block_until_ready(out2)
    ref2 = linear_pool_crps_reference(
        [x.astype(jnp.float32) for x in list_inputs2], weights2, apply_softmax=True)
    assert out2.shape == (batch2, support_len2)
    assert jnp.allclose(out2, ref2, atol=1e-4, rtol=1e-4)

    print("KERNEL_OK")
</pallas_src>

<mosaic_0001>
module attributes {stable_mosaic.version = 11 : i64} {
  func.func @_linear_pool_crps_kernel(%arg0: i32, %arg1: i32, %arg2: memref<4xf32, #tpu.memory_space<smem>>, %arg3: memref<8x16xf32, #tpu.memory_space<vmem>>, %arg4: memref<8x16xf32, #tpu.memory_space<vmem>>, %arg5: memref<8x16xf32, #tpu.memory_space<vmem>>, %arg6: memref<8x16xf32, #tpu.memory_space<vmem>>, %arg7: memref<16x16xf32, #tpu.memory_space<vmem>>, %arg8: memref<8x16xf32, #tpu.memory_space<vmem>>, %arg9: memref<8x1xf32, #tpu.memory_space<vmem>>) attributes {dimension_semantics = [#tpu.dimension_semantics<parallel>, #tpu.dimension_semantics<arbitrary>], iteration_bounds = array<i64: 1, 1>, scalar_prefetch = 0 : i64, scratch_operands = 1 : i64, tpu.core_type = #tpu.core_type<tc>, window_params = [{transform_indices = @transform_0, window_bounds = array<i64: 4>}, {transform_indices = @transform_1, window_bounds = array<i64: 8, 16>}, {transform_indices = @transform_2, window_bounds = array<i64: 8, 16>}, {transform_indices = @transform_3, window_bounds = array<i64: 8, 16>}, {transform_indices = @transform_4, window_bounds = array<i64: 8, 16>}, {pipeline_mode = #tpu.pipeline_mode<synchronous>, transform_indices = @transform_5, window_bounds = array<i64: 16, 16>}, {transform_indices = @transform_6, window_bounds = array<i64: 8, 16>}]} {
    %c0_i32 = arith.constant 0 : i32
    %0 = arith.cmpi eq, %arg1, %c0_i32 : i32
    %1 = arith.extui %0 : i1 to i32
    %c0_i32_0 = arith.constant 0 : i32
    %2 = arith.cmpi ne, %1, %c0_i32_0 : i32
    scf.if %2 {
      %cst_19 = arith.constant 0.000000e+00 : f32
      %32 = vector.broadcast %cst_19 : f32 to vector<8x1xf32>
      %c0_20 = arith.constant 0 : index
      %c0_21 = arith.constant 0 : index
      %33 = vector.load %arg9[%c0_20, %c0_21] : memref<8x1xf32, #tpu.memory_space<vmem>>, vector<8x1xf32>
      tpu.vector_store %arg9[%c0_20, %c0_21], %32 {strides = array<i32>} : memref<8x1xf32, #tpu.memory_space<vmem>>, vector<8x1xf32>,
    } else {
    }
    %c0 = arith.constant 0 : index
    %3 = memref.load %arg2[%c0] : memref<4xf32, #tpu.memory_space<smem>>
    %c0_1 = arith.constant 0 : index
    %c0_2 = arith.constant 0 : index
    %4 = vector.load %arg3[%c0_1, %c0_2] : memref<8x16xf32, #tpu.memory_space<vmem>>, vector<8x16xf32>
    %5 = vector.broadcast %3 : f32 to vector<8x16xf32>
    %6 = arith.mulf %5, %4 : vector<8x16xf32>
    %c1 = arith.constant 1 : index
    %7 = memref.load %arg2[%c1] : memref<4xf32, #tpu.memory_space<smem>>
    %c0_3 = arith.constant 0 : index
    %c0_4 = arith.constant 0 : index
    %8 = vector.load %arg4[%c0_3, %c0_4] : memref<8x16xf32, #tpu.memory_space<vmem>>, vector<8x16xf32>
    %9 = vector.broadcast %7 : f32 to vector<8x16xf32>
    %10 = arith.mulf %9, %8 : vector<8x16xf32>
    %11 = arith.addf %6, %10 : vector<8x16xf32>
    %c2 = arith.constant 2 : index
    %12 = memref.load %arg2[%c2] : memref<4xf32, #tpu.memory_space<smem>>
    %c0_5 = arith.constant 0 : index
    %c0_6 = arith.constant 0 : index
    %13 = vector.load %arg5[%c0_5, %c0_6] : memref<8x16xf32, #tpu.memory_space<vmem>>, vector<8x16xf32>
    %14 = vector.broadcast %12 : f32 to vector<8x16xf32>
    %15 = arith.mulf %14, %13 : vector<8x16xf32>
    %16 = arith.addf %11, %15 : vector<8x16xf32>
    %c3 = arith.constant 3 : index
    %17 = memref.load %arg2[%c3] : memref<4xf32, #tpu.memory_space<smem>>
    %c0_7 = arith.constant 0 : index
    %c0_8 = arith.constant 0 : index
    %18 = vector.load %arg6[%c0_7, %c0_8] : memref<8x16xf32, #tpu.memory_space<vmem>>, vector<8x16xf32>
    %19 = vector.broadcast %17 : f32 to vector<8x16xf32>
    %20 = arith.mulf %19, %18 : vector<8x16xf32>
    %21 = arith.addf %16, %20 : vector<8x16xf32>
    %c0_9 = arith.constant 0 : index
    %c0_10 = arith.constant 0 : index
    %22 = vector.load %arg7[%c0_9, %c0_10] : memref<16x16xf32, #tpu.memory_space<vmem>>, vector<16x16xf32>
    %cst = arith.constant dense<0.000000e+00> : vector<8x16xf32>
    %23 = tpu.matmul %21, %22, %cst {dimension_numbers = #tpu.dot_dimension_numbers<[1], [0], [0], [1], [0, 0, 1, 1], [], []>, precision = #tpu.contract_precision<fp32>} : vector<8x16xf32>, vector<16x16xf32>, vector<8x16xf32> -> vector<8x16xf32>
    %c0_11 = arith.constant 0 : index
    %c0_12 = arith.constant 0 : index
    %24 = vector.load %arg9[%c0_11, %c0_12] : memref<8x1xf32, #tpu.memory_space<vmem>>, vector<8x1xf32>
    %25 = vector.broadcast %24 : vector<8x1xf32> to vector<8x16xf32>
    %26 = arith.addf %25, %23 : vector<8x16xf32>
    %c0_13 = arith.constant 0 : index
    %c0_14 = arith.constant 0 : index
    %27 = vector.load %arg8[%c0_13, %c0_14] : memref<8x16xf32, #tpu.memory_space<vmem>>, vector<8x16xf32>
    tpu.vector_store %arg8[%c0_13, %c0_14], %26 {strides = array<i32>} : memref<8x16xf32, #tpu.memory_space<vmem>>, vector<8x16xf32>,
    %c0_15 = arith.constant 0 : index
    %c0_16 = arith.constant 0 : index
    %28 = vector.load %arg9[%c0_15, %c0_16] : memref<8x1xf32, #tpu.memory_space<vmem>>, vector<8x1xf32>
    %29 = vector.extract_strided_slice %23 {offsets = [0, 15], sizes = [8, 1], strides = [1, 1]} : vector<8x16xf32> to vector<8x1xf32>
    %30 = arith.addf %28, %29 : vector<8x1xf32>
    %c0_17 = arith.constant 0 : index
    %c0_18 = arith.constant 0 : index
    %31 = vector.load %arg9[%c0_17, %c0_18] : memref<8x1xf32, #tpu.memory_space<vmem>>, vector<8x1xf32>
    tpu.vector_store %arg9[%c0_17, %c0_18], %30 {strides = array<i32>} : memref<8x1xf32, #tpu.memory_space<vmem>>, vector<8x1xf32>,
    return
  }
  func.func @transform_0(%arg0: i32, %arg1: i32) -> i32 {
    %c0_i32 = arith.constant 0 : i32
    %c0_i32_0 = arith.constant 0 : i32
    return %c0_i32 : i32
  }
  func.func @transform_1(%arg0: i32, %arg1: i32) -> (i32, i32) {
    %c0_i32 = arith.constant 0 : i32
    return %arg0, %arg1 : i32, i32
  }
  func.func @transform_2(%arg0: i32, %arg1: i32) -> (i32, i32) {
    %c0_i32 = arith.constant 0 : i32
    return %arg0, %arg1 : i32, i32
  }
  func.func @transform_3(%arg0: i32, %arg1: i32) -> (i32, i32) {
    %c0_i32 = arith.constant 0 : i32
    return %arg0, %arg1 : i32, i32
  }
  func.func @transform_4(%arg0: i32, %arg1: i32) -> (i32, i32) {
    %c0_i32 = arith.constant 0 : i32
    return %arg0, %arg1 : i32, i32
  }
  func.func @transform_5(%arg0: i32, %arg1: i32) -> (i32, i32) {
    %c0_i32 = arith.constant 0 : i32
    %c0_i32_0 = arith.constant 0 : i32
    %c0_i32_1 = arith.constant 0 : i32
    return %c0_i32, %c0_i32_0 : i32, i32
  }
  func.func @transform_6(%arg0: i32, %arg1: i32) -> (i32, i32) {
    %c0_i32 = arith.constant 0 : i32
    return %arg0, %arg1 : i32, i32
  }
}

</mosaic_0001>

<bundles_post_ra>
// kernel: tpu_custom_call.1
= control target key start
LH: loop header
LB: loop body
LE: loop exit
PB: predicated region body
PF: predicated region fallthrough
CT: control target
= control target key end

     0   :  { %11 = vsyncpa [#allocation6], 0  ;;  %s983_s0 = inlined_call_operand.hbm [shape: f32[4], index: 0, kind: input, shape index: {}]   ;;  %s984_s1 = inlined_call_operand.hbm [shape: f32[8,16], index: 1, kind: input, shape index: {}]   ;;  %s985_s2 = inlined_call_operand.hbm [shape: f32[8,16], index: 2, kind: input, shape index: {}]   ;;  %s986_s3 = inlined_call_operand.hbm [shape: f32[8,16], index: 3, kind: input, shape index: {}]   ;;  %s987_s4 = inlined_call_operand.hbm [shape: f32[8,16], index: 4, kind: input, shape index: {}]   ;;  %s988_s5 = inlined_call_operand.vmem [shape: f32[16,16], index: 5, kind: input, shape index: {}]   ;;  %s989_s6 = inlined_call_operand.hbm [shape: f32[8,16], index: 6, kind: output, shape index: {}]  }
   0x1   :  { %12 = vsyncpa [#allocation4], 0 }
   0x2   :  { %13 = vsyncpa [#allocation9], 0 }
   0x3   :  { %14 = vsyncpa [#allocation12], 0 }
   0x4   :  { %15 = vsyncpa [#allocation5], 0  ;;  %s838_s21 = smov [#allocation8]   ;;  %s839_s23 = smov [#allocation7]  }
   0x5   :  { %s40_s22 = sshll.u32 %s838_s21, 4  ;;  %s30_s24 = sshll.u32 %s839_s23, 4  ;;  %s41_s22 = int_to_ptr.vmem [resolvable:$true] %s40_s22  ;;  %s31_s24 = int_to_ptr.vmem [resolvable:$true] %s30_s24 }
   0x6   :  { %s708_s27 = scalar_lea.hbm %s985_s2, 128 }
   0x7   :  { %p709_p0 = scmp.ne.s32.totalorder %s985_s2, %s708_s27  ;;  %p712_p1 = scmp.lt.u32.totalorder %s708_s27, %s985_s2 }
   0x9   :  { %p714_p2 = pnand %p712_p1, %p709_p0 }
   0xb   :  { %717 = shalt.err (!%p714_p2)
}
   0xc   :  { %s718_s8 = scalar_lea.vmem %s41_s22, 128  ;;  %p723_p4 = scmp.lt.s32.totalorder %s41_s22, %s41_s22 }
   0xd   :  { %p719_p3 = scmp.ne.s32.totalorder %s41_s22, %s718_s8  ;;  %p724_p5 = scmp.lt.s32.totalorder %s718_s8, %s718_s8 }
   0xf   :  { %p725_p6 = por %p724_p5, %p723_p4 }
  0x11   :  { %p726_p7 = pnand %p725_p6, %p719_p3 }
  0x13   :  { %729 = shalt.err (!%p726_p7)
}
  0x14   :  { %43 = dma.hbm_to_vmem [thread:$0]  %s985_s2, 128, %s41_s22, [#allocation9]  }
  0x15   :  { %s730_s13 = scalar_lea.hbm %s983_s0, 16 }
  0x16   :  { %p731_p8 = scmp.ne.s32.totalorder %s983_s0, %s730_s13  ;;  %p734_p9 = scmp.lt.u32.totalorder %s730_s13, %s983_s0 }
  0x18   :  { %p736_p10 = pnand %p734_p9, %p731_p8 }
  0x1a   :  { %739 = shalt.err (!%p736_p10)
}
  0x1b   :  { %s840_s18 = smov [#allocation3]   ;;  %s740_s22 = scalar_lea.hbm %s984_s1, 128 }
  0x1c   :  { %23 = dma.hbm_to_smem %s983_s0, 16, %s840_s18, [#allocation6]  }
  0x1d   :  { %p741_p11 = scmp.ne.s32.totalorder %s984_s1, %s740_s22  ;;  %p744_p12 = scmp.lt.u32.totalorder %s740_s22, %s984_s1 }
  0x1f   :  { %p746_p13 = pnand %p744_p12, %p741_p11 }
  0x21   :  { %749 = shalt.err (!%p746_p13)
}
  0x22   :  { %s750_s28 = scalar_lea.vmem %s31_s24, 128  ;;  %p755_p1 = scmp.lt.s32.totalorder %s31_s24, %s31_s24 }
  0x23   :  { %p751_p0 = scmp.ne.s32.totalorder %s31_s24, %s750_s28  ;;  %p756_p2 = scmp.lt.s32.totalorder %s750_s28, %s750_s28 }
  0x25   :  { %p757_p3 = por %p756_p2, %p755_p1 }
  0x27   :  { %p758_p4 = pnand %p757_p3, %p751_p0 }
  0x29   :  { %761 = shalt.err (!%p758_p4)
}
  0x2a   :  { %33 = dma.hbm_to_vmem [thread:$0]  %s984_s1, 128, %s31_s24, [#allocation4]  }
  0x2b   :  { %s841_s30 = smov [#allocation10]   ;;  %s842_s8 = smov [#allocation11]  }
  0x2c   :  { %s50_s7 = sshll.u32 %s841_s30, 4  ;;  %s60_s9 = sshll.u32 %s842_s8, 4  ;;  %s51_s7 = int_to_ptr.vmem [resolvable:$true] %s50_s7  ;;  %s61_s9 = int_to_ptr.vmem [resolvable:$true] %s60_s9 }
  0x2d   :  { %s762_s12 = scalar_lea.hbm %s986_s3, 128 }
  0x2e   :  { %p763_p5 = scmp.ne.s32.totalorder %s986_s3, %s762_s12  ;;  %p766_p6 = scmp.lt.u32.totalorder %s762_s12, %s986_s3 }
  0x30   :  { %p768_p7 = pnand %p766_p6, %p763_p5 }
  0x32   :  { %771 = shalt.err (!%p768_p7)
}
  0x33   :  { %s772_s1 = scalar_lea.vmem %s51_s7, 128  ;;  %p777_p9 = scmp.lt.s32.totalorder %s51_s7, %s51_s7 }
  0x34   :  { %p773_p8 = scmp.ne.s32.totalorder %s51_s7, %s772_s1  ;;  %p778_p10 = scmp.lt.s32.totalorder %s772_s1, %s772_s1 }
  0x36   :  { %p779_p11 = por %p778_p10, %p777_p9 }
  0x38   :  { %p780_p12 = pnand %p779_p11, %p773_p8 }
  0x3a   :  { %783 = shalt.err (!%p780_p12)
}
  0x3b   :  { %53 = dma.hbm_to_vmem [thread:$0]  %s986_s3, 128, %s51_s7, [#allocation9]  }
  0x3c   :  { %s784_s20 = scalar_lea.hbm %s987_s4, 128 }
  0x3d   :  { %p785_p13 = scmp.ne.s32.totalorder %s987_s4, %s784_s20  ;;  %p788_p0 = scmp.lt.u32.totalorder %s784_s20, %s987_s4 }
  0x3f   :  { %p790_p1 = pnand %p788_p0, %p785_p13 }
  0x41   :  { %793 = shalt.err (!%p790_p1)
}
  0x42   :  { %s794_s25 = scalar_lea.vmem %s61_s9, 128  ;;  %p799_p3 = scmp.lt.s32.totalorder %s61_s9, %s61_s9 }
  0x43   :  { %p795_p2 = scmp.ne.s32.totalorder %s61_s9, %s794_s25  ;;  %p800_p4 = scmp.lt.s32.totalorder %s794_s25, %s794_s25 }
  0x45   :  { %p801_p5 = por %p800_p4, %p799_p3 }
  0x47   :  { %p802_p6 = pnand %p801_p5, %p795_p2 }
  0x49   :  { %805 = shalt.err (!%p802_p6)
}
  0x4a   :  { %63 = dma.hbm_to_vmem [thread:$0]  %s987_s4, 128, %s61_s9, [#allocation12]  }
  0x4b   :  { %828 = dma.done.wait [#allocation6], 16  }
  0x4c   :  { %829 = vsyncadd [#allocation6], 4294967280 }
  0x4d   :  { %830 = dma.done.wait [#allocation4], 128  }
  0x4e   :  { %831 = vsyncadd [#allocation4], 4294967168 }
  0x4f   :  { %832 = dma.done.wait [#allocation9], 256  }
  0x50   :  { %833 = vsyncadd [#allocation9], 4294967040 }
  0x51   :  { %834 = dma.done.wait [#allocation12], 128  }
  0x52   :  { %835 = vsyncadd [#allocation12], 4294967168 }
  0x53   :  { %81 = sfence }
  0x54   :  { %v107_v0 = vld [vmem:[%s988_s5] sm:$0xff]  ;;  %v108_v1 = vld [vmem:[%s988_s5 + $0x8] sm:$0xff]  ;;  %vm86_vm0 = vcmask 7168   ;;  %v843_v2 = vmov 0.0|0.0   ;;  %v844_v5 = vmov 0.0   ;;  %s88_s4 = sld [smem:[#allocation3]] }
  0x55   :  { %678 = vmatprep.subr.bf16.mxu0 %v843_v2  ;;  %v114_v3 = vand.u32 4294901760, %v107_v0  ;;  %v117_v4 = vand.u32 4294901760, %v108_v1  ;;  %669 = vmatprep.subr.bf16.mxu1 %v843_v2  ;;  %87 = vst.msk [vmem:[#allocation2] sm:$0xff] %vm86_vm0, %v844_v5  ;;  %vm845_vm1 = vmmov 0   ;;  %s606_s30 = sld [smem:[#allocation3 + $0x1]]  ;;  %s607_s7 = sld [smem:[#allocation3 + $0x2]] }
  0x56   :  { %652 = vmatprep.mubr.msk.f32.mxu0 %vm845_vm1, %v844_v5  ;;  %631 = vmatprep.mubr.msk.f32.mxu1 %vm845_vm1, %v844_v5  ;;  %s608_s5 = sld [smem:[#allocation3 + $0x3]]  ;;  %v89_v7 = vld [vmem:[#allocation7] sm:$0xff]  ;;  %v93_v8 = vld [vmem:[#allocation8] sm:$0xff]  ;;  %v98_v9 = vld [vmem:[#allocation10] sm:$0xff]  ;;  %v846_v11 = vmov 0   ;;  %vm109_vm2 = vcmask 130048  }
  0x57   :  { %v670_v6 = vpack.c.bf16 %v117_v4, %v114_v3  ;;  %707 = vset.pattern.permute.xlu0 %v846_v11  ;;  %v192_v12 = vsub.f32 %v107_v0, %v114_v3  ;;  %v103_v16 = vld [vmem:[#allocation11] sm:$0xff]  ;;  %v199_v18 = vsub.f32 %v108_v1, %v117_v4  ;;  %s847_s8 = smov [#allocation13]   ;;  %s848_s10 = smov 113  }
  0x58   :  { %s594_s9 = sshll.u32 %s847_s8, 4  ;;  %s595_s9 = int_to_ptr.vmem [resolvable:$true] %s594_s9 }
  0x59   :  { %680 = vmatpush3.bf16.msra.mxu0 %v670_v6  ;;  %671 = vmatpush3.bf16.msra.mxu1 %v670_v6  ;;  %v193_v25 = vand.u32 4294901760, %v192_v12  ;;  %v200_v26 = vand.u32 4294901760, %v199_v18  ;;  %v676_v40 = vpack.c.bf16 %v199_v18, %v192_v12  ;;  %s806_s11 = scalar_lea.vmem %s595_s9, 128  ;;  %p811_p8 = scmp.lt.s32.totalorder %s595_s9, %s595_s9 }
  0x5a   :  { %672 = vmatprep.subr.bf16.mxu1 %v843_v2  ;;  %681 = vmatprep.subr.bf16.mxu0 %v843_v2  ;;  %v90_v10 = vstv %s88_s4  ;;  %p807_p7 = scmp.ne.s32.totalorder %s595_s9, %s806_s11  ;;  %p812_p9 = scmp.lt.s32.totalorder %s806_s11, %s806_s11 }
  0x5b   :  { %v91_v13 = vmul.f32 %v90_v10, %v89_v7  ;;  %v94_v14 = vstv %s606_s30  ;;  %v99_v15 = vstv %s607_s7  ;;  %v194_v29 = vsub.f32 %v192_v12, %v193_v25 }
  0x5c   :  { %v956_v17 = vld [vmem:[#allocation2] sm:$0xff]  ;;  %v95_v19 = vmul.f32 %v94_v14, %v93_v8  ;;  %v100_v20 = vmul.f32 %v99_v15, %v98_v9  ;;  %v104_v21 = vstv %s608_s5  ;;  %v201_v30 = vsub.f32 %v199_v18, %v200_v26  ;;  %p813_p10 = por %p812_p9, %p811_p8 }
  0x5d   :  { %575 = vperm.xlu0 %707, %v956_v17   ;;  %v105_v23 = vmul.f32 %v104_v21, %v103_v16  ;;  %v195_v33 = vand.u32 4294901760, %v194_v29  ;;  %v682_v35 = vpack.c.bf16 %v200_v26, %v193_v25 }
  0x5e   :  { %v96_v22 = vadd.f32 %v95_v19, %v91_v13  ;;  %v202_v34 = vand.u32 4294901760, %v201_v30  ;;  %p814_p11 = pnand %p813_p10, %p807_p7 }
  0x60   :  { %v101_v24 = vadd.f32 %v100_v20, %v96_v22  ;;  %v673_v38 = vpack.c.bf16 %v202_v34, %v195_v33 }
  0x62   :  { %v106_v27 = vadd.f32 %v105_v23, %v101_v24 }
  0x64   :  { %v111_v28 = vsel %vm109_vm2, %v106_v27, 0 }
  0x65   :  { %v180_v31 = vand.u32 4294901760, %v111_v28 }
  0x67   :  { %v181_v32 = vsub.f32 %v111_v28, %v180_v31 }
  0x69   :  { %v182_v36 = vand.u32 4294901760, %v181_v32 }
  0x6b   :  { %653 = vmatmul.mubr.f32.vlgmr.msra.gmra.mrb[0].mxu0 %v182_v36  ;;  %v183_v37 = vsub.f32 %v181_v32, %v182_v36 }
  0x6c   :  { %683 = vmatpush3.bf16.msra.mxu0 %v682_v35  ;;  %659 = vmatprep.mubr.msk.f32.mxu0 %vm845_vm1, %v844_v5 }
  0x6d   :  { %v184_v39 = vand.u32 4294901760, %v183_v37  ;;  %684 = vmatprep.subr.bf16.mxu0 %v843_v2 }
  0x6f   :  { %632 = vmatmul.mubr.f32.vlgmr.msra.gmra.mrb[0].mxu1 %v184_v39 }
  0x70   :  { %674 = vmatpush3.bf16.msra.mxu1 %v673_v38  ;;  %638 = vmatprep.mubr.msk.f32.mxu1 %vm845_vm1, %v844_v5 }
  0x71   :  { %675 = vmatprep.subr.bf16.mxu1 %v843_v2 }
  0x73   :  { %660 = vmatmul.mubr.f32.vlgmr.msra.gmra.mrb[0].mxu0 %v180_v31 }
  0x74   :  { %686 = vmatpush3.bf16.msra.mxu0 %v670_v6  ;;  %666 = vmatprep.mubr.msk.f32.mxu0 %vm845_vm1, %v844_v5 }
  0x77   :  { %639 = vmatmul.mubr.f32.vlgmr.msra.gmra.mrb[0].mxu1 %v180_v31 }
  0x78   :  { %677 = vmatpush3.bf16.msra.mxu1 %v676_v40  ;;  %645 = vmatprep.mubr.msk.f32.mxu1 %vm845_vm1, %v844_v5 }
  0x7b   :  { %667 = vmatmul.mubr.f32.vlgmr.msra.gmra.mrb[0].mxu0 %v180_v31 }
  0x7f   :  { %646 = vmatmul.mubr.f32.vlgmr.msra.gmra.mrb[0].mxu1 %v181_v32 }
  0xdc   :  { %v576_v44 = vpop.permute.xlu0 %575 }
 0x14e   :  { %v568_v41 = vpop.f32.mrb[0].mxu0 }
 0x14f   :  { %v668_v42 = vpop.f32.mrb[1].mxu0 }
 0x152   :  { %v343_v43 = vpop.f32.mrb[0].mxu1 }
 0x153   :  { %v687_v45 = vadd.f32 %v568_v41, %v343_v43  ;;  %v647_v46 = vpop.f32.mrb[1].mxu1 }
 0x155   :  { %v578_v47 = vadd.f32 %v687_v45, %v576_v44  ;;  %582 = vrot.lane.b32.xlu0 %v687_v45, %s848_s10 }
 0x157   :  { %579 = vst.msk [vmem:[#allocation13] sm:$0xff] %vm109_vm2, %v578_v47 }
 0x158   :  { %817 = shalt.err (!%p814_p11)
}
 0x159   :  { %s818_s14 = scalar_lea.hbm %s989_s6, 128 }
 0x15a   :  { %p819_p12 = scmp.ne.s32.totalorder %s989_s6, %s818_s14  ;;  %p822_p13 = scmp.lt.u32.totalorder %s818_s14, %s989_s6 }
 0x15c   :  { %p824_p0 = pnand %p822_p13, %p819_p12 }
 0x15e   :  { %827 = shalt.err (!%p824_p0)
}
 0x15f   :  { %597 = dma.vmem_to_hbm [thread:$0]  %s595_s9, 128, %s989_s6, [#allocation5]  }
 0x1c7   :  { %v583_v48 = vpop.permute.xlu0 %582 }
 0x1c8   :  { %v585_v49 = vadd.f32 %v583_v48, %v956_v17 }
 0x1ca   :  { %587 = vst.msk [vmem:[#allocation2] sm:$0xff] %vm86_vm0, %v585_v49 }
 0x1cb   :  { %836 = dma.done.wait [#allocation5], 128  }
 0x1cc   :  { %837 = vsyncadd [#allocation5], 4294967168 }
 0x1cd   :  { %601 = vsyncpa [#allocation4], 1 }
 0x1ce   :  { %602 = vsyncpa [#allocation9], 1 }
 0x1cf   :  { %603 = vsyncpa [#allocation12], 1 }
 0x1d0   :  { %604 = vsyncpa [#allocation5], 1 }
 0x1d1   :  { %605 = vsyncpa [#allocation6], 1 }

</bundles_post_ra>
